<compile_context>
chip_gen: v5e
topology: v5e:2x2
jax: 0.10.0
libtpu: 0.0.40
codegen_flags: <defaults>
</compile_context>

<pallas_src>
import functools

import jax
import jax.numpy as jnp
from jax.experimental import pallas as pl
from jax.experimental.pallas import tpu as pltpu


# ------------------------------ tuning knobs --------------------------------

_MAX_LANE_WIDTH = 16384              # cap flattened last dim (keeps tiles sane)
_DMA_CHUNK_BYTES = 16 * 1024 * 1024  # ~16 MiB per in-flight HBM->HBM DMA chunk
_MAX_DMA_CHUNKS = 8                  # at most 8 DMAs in flight
_VMEM_BLOCK_BYTES = 8 * 1024 * 1024  # fallback path: 8 MiB VMEM blocks


# ------------------------------ shape plumbing ------------------------------

def _row_granularity(dtype) -> int:
    # Sub-32-bit dtypes pack along sublanes (one vreg = [16,128] bf16 /
    # [32,128] int8), so keep row counts multiples of 32//itemsize.
    return max(8, 32 // dtype.itemsize)


def _as_lane_dense_2d(x: jax.Array) -> jax.Array:
    """Flatten x to a 2-D slab whose last dim is a multiple of 128 if possible.

    Lane-dense last dims give unmasked full-width vector stores on the VMEM
    fallback path; the search accepts ANY multiple of 128 that divides the
    element count (e.g. 384, 640, 1152), not just powers of two.
    """
    total = int(x.size)
    g = _row_granularity(x.dtype)

    def search(min_rows):
        best = 0
        c = 128
        stop = min(_MAX_LANE_WIDTH, total)
        while c <= stop:
            if total % c == 0 and total // c >= min_rows:
                best = c
            c += 128
        return best

    c = search(g)            # lane-dense AND fills whole (packed) vregs
    if c == 0:
        c = search(1)        # lane-dense only (tiny arrays)
    if c:
        return x.reshape(total // c, c)
    # No lane-dense factorization exists (odd element counts). This is correct
    # but drops to masked partial stores on the VMEM fallback path; the DMA
    # path is byte-based and does not care about lane density.
    if x.ndim >= 2 and x.shape[-1] >= 128:
        return x.reshape(-1, x.shape[-1])
    return x.reshape(1, total)


def _row_chunks(rows: int, row_bytes: int, g: int):
    """Static (start, size) row chunks for the HBM->HBM DMA path."""
    total_bytes = rows * row_bytes
    if rows <= g or total_bytes <= _DMA_CHUNK_BYTES:
        return ((0, rows),)
    chunk_rows = max(_DMA_CHUNK_BYTES // row_bytes, g)
    chunk_rows -= chunk_rows % g
    n_chunks = -(-rows // chunk_rows)
    if n_chunks > _MAX_DMA_CHUNKS:
        chunk_rows = -(-rows // _MAX_DMA_CHUNKS)
        chunk_rows += (-chunk_rows) % g            # round up to multiple of g
    chunks = []
    start = 0
    while start < rows:
        size = min(chunk_rows, rows - start)
        chunks.append((start, size))
        start += size
    return tuple(chunks)


# --------------------- primary path: direct HBM->HBM DMA --------------------

def _dma_copy_kernel(x_hbm, o_hbm, sems, *, chunks):
    # Pure streaming copy: start every chunk's DMA (<= _MAX_DMA_CHUNKS in
    # flight, one semaphore each), then wait for all. No VMEM, no vregs.
    copies = [
        pltpu.make_async_copy(
            x_hbm.at[pl.ds(start, size), :],
            o_hbm.at[pl.ds(start, size), :],
            sems.at[i],
        )
        for i, (start, size) in enumerate(chunks)
    ]
    for cp in copies:
        cp.start()
    for cp in copies:
        cp.wait()


def _identity_copy_dma(x2: jax.Array, nbytes: int, chunks=None) -> jax.Array:
    rows, cols = x2.shape
    if chunks is None:
        g = _row_granularity(x2.dtype)
        chunks = _row_chunks(rows, cols * x2.dtype.itemsize, g)
    return pl.pallas_call(
        functools.partial(_dma_copy_kernel, chunks=chunks),
        out_shape=jax.ShapeDtypeStruct((rows, cols), x2.dtype),
        in_specs=[pl.BlockSpec(memory_space=pl.ANY)],
        out_specs=pl.BlockSpec(memory_space=pl.ANY),
        scratch_shapes=[pltpu.SemaphoreType.DMA((len(chunks),))],
        # Pure stream: 0 FLOPs, read + write of the whole array.
        cost_estimate=pl.CostEstimate(
            flops=0, transcendentals=0, bytes_accessed=2 * nbytes),
    )(x2)


# ---------------- fallback path: VMEM-staged BlockSpec pipeline -------------

def _vmem_copy_kernel(x_ref, o_ref):
    o_ref[...] = x_ref[...]


def _identity_copy_vmem(x2: jax.Array, nbytes: int) -> jax.Array:
    rows, cols = x2.shape
    itemsize = x2.dtype.itemsize
    g = _row_granularity(x2.dtype)

    if rows <= g:
        tile_rows = rows                      # full row extent: always legal
    else:
        budget_rows = max(_VMEM_BLOCK_BYTES // (cols * itemsize), g)
        tile_rows = min(max((budget_rows // g) * g, g), rows)

    grid = (pl.cdiv(rows, tile_rows),)        # partial last block is masked

    block_bytes = tile_rows * cols * itemsize
    # 2x(in) + 2x(out) double-buffered blocks + headroom, capped so it leaves
    # room for compiler scratch inside v7x's 64 MiB physical VMEM.
    vmem_limit = int(min(max(4 * block_bytes + (4 << 20), 8 << 20), 40 << 20))

    return pl.pallas_call(
        _vmem_copy_kernel,
        out_shape=jax.ShapeDtypeStruct((rows, cols), x2.dtype),
        grid_spec=pltpu.PrefetchScalarGridSpec(
            num_scalar_prefetch=0,
            grid=grid,
            in_specs=[pl.BlockSpec((tile_rows, cols), lambda i: (i, 0))],
            out_specs=pl.BlockSpec((tile_rows, cols), lambda i: (i, 0)),
        ),
        compiler_params=pltpu.CompilerParams(
            dimension_semantics=("parallel",),
            vmem_limit_bytes=vmem_limit,
        ),
        cost_estimate=pl.CostEstimate(
            flops=0, transcendentals=0, bytes_accessed=2 * nbytes),
        # NOTE: no input_output_aliases -- force_copy must hand back a fresh
        # buffer, and aliasing a non-donated input costs a defensive copy.
    )(x2)


# ------------------------------ dispatch -------------------------------------

_DMA_SUPPORTED = None


def _dma_copy_supported() -> bool:
    """One-time eager probe: does this backend lower local HBM->HBM DMA?"""
    global _DMA_SUPPORTED
    if _DMA_SUPPORTED is None:
        try:
            probe = jnp.arange(16 * 128, dtype=jnp.float32).reshape(16, 128)
            # Two sliced chunks so the probe exercises the real code path.
            out = _identity_copy_dma(probe, int(probe.nbytes),
                                     chunks=((0, 8), (8, 8)))
            jax.block_until_ready(out)
            _DMA_SUPPORTED = bool(jnp.array_equal(out, probe))
        except Exception:  # fall back to the VMEM-staged pipeline
            _DMA_SUPPORTED = False
    return _DMA_SUPPORTED


def _identity_copy(x: jax.Array) -> jax.Array:
    """Materialize identity(x) as a fresh array via a Pallas streaming copy."""
    orig_shape = x.shape
    x2 = _as_lane_dense_2d(x)
    nbytes = int(x.size) * x.dtype.itemsize
    if _dma_copy_supported():
        out2 = _identity_copy_dma(x2, nbytes)
    else:
        out2 = _identity_copy_vmem(x2, nbytes)
    return out2.reshape(orig_shape)


def identity(x: jax.Array, *, force_copy: bool = False) -> jax.Array:
    """Forward pass of Identity: return the input unchanged.

    Identity is argument-insensitive, so the default path returns `x` directly
    (zero HBM traffic). `force_copy=True` routes through the Pallas streaming
    copy and returns a genuinely fresh buffer (no input/output aliasing).
    """
    if not force_copy or x.size == 0:
        return x
    return _identity_copy(x)


if __name__ == "__main__":
    key = jax.random.PRNGKey(0)
    # Small NCHW-ish input consistent with Identity's placeholder usage.
    x = jax.random.normal(key, (2, 4, 16, 16), dtype=jnp.float32)

    # Fast path: argument-insensitive identity -> no kernel, no copy.
    y_fast = identity(x)
    assert y_fast is x

    # Kernel path: fresh buffer via the Pallas streaming copy.
    y = identity(x, force_copy=True)
    jax.block_until_ready(y)
    assert y.shape == x.shape and y.dtype == x.dtype
    assert bool(jnp.all(y == x))

    # Exercise a packed dtype and the non-lane-dense fallback shape too.
    x2 = jax.random.normal(jax.random.PRNGKey(1), (3, 5, 7)).astype(jnp.bfloat16)
    y2 = identity(x2, force_copy=True)
    jax.block_until_ready(y2)
    assert y2.shape == x2.shape and y2.dtype == x2.dtype
    assert bool(jnp.all(y2 == x2))

    print("KERNEL_OK")
</pallas_src>

<mosaic_0001>
module attributes {stable_mosaic.version = 11 : i64} {
  func.func @_dma_copy_kernel(%arg0: memref<16x128xf32, #tpu.memory_space<any>>, %arg1: memref<16x128xf32, #tpu.memory_space<any>>, %arg2: memref<2x!tpu.dma_semaphore, #tpu.memory_space<semaphore_mem>>) attributes {dimension_semantics = [], scalar_prefetch = 0 : i64, scratch_operands = 1 : i64, tpu.core_type = #tpu.core_type<tc>} {
    %c0_i32 = arith.constant 0 : i32
    %c0_i32_0 = arith.constant 0 : i32
    %c0_i32_1 = arith.constant 0 : i32
    %0 = tpu.memref_slice %arg0[%c0_i32_0, %c0_i32_1] : memref<16x128xf32, #tpu.memory_space<any>> -> memref<8x128xf32, #tpu.memory_space<any>>
    %c0_i32_2 = arith.constant 0 : i32
    %c0_i32_3 = arith.constant 0 : i32
    %1 = tpu.memref_slice %arg1[%c0_i32_2, %c0_i32_3] : memref<16x128xf32, #tpu.memory_space<any>> -> memref<8x128xf32, #tpu.memory_space<any>>
    %2 = tpu.memref_slice %arg2[%c0_i32] : memref<2x!tpu.dma_semaphore, #tpu.memory_space<semaphore_mem>> -> memref<1x!tpu.dma_semaphore, #tpu.memory_space<semaphore_mem>>
    %3 = tpu.memref_squeeze %2 : memref<1x!tpu.dma_semaphore, #tpu.memory_space<semaphore_mem>> -> memref<!tpu.dma_semaphore, #tpu.memory_space<semaphore_mem>>
    tpu.enqueue_dma source(%0 : memref<8x128xf32, #tpu.memory_space<any>>) target(%1 : memref<8x128xf32, #tpu.memory_space<any>>) target_semaphore(%3 : memref<!tpu.dma_semaphore, #tpu.memory_space<semaphore_mem>>)
    %c1_i32 = arith.constant 1 : i32
    %c8_i32 = arith.constant 8 : i32
    %c0_i32_4 = arith.constant 0 : i32
    %4 = tpu.memref_slice %arg0[%c8_i32, %c0_i32_4] : memref<16x128xf32, #tpu.memory_space<any>> -> memref<8x128xf32, #tpu.memory_space<any>>
    %c8_i32_5 = arith.constant 8 : i32
    %c0_i32_6 = arith.constant 0 : i32
    %5 = tpu.memref_slice %arg1[%c8_i32_5, %c0_i32_6] : memref<16x128xf32, #tpu.memory_space<any>> -> memref<8x128xf32, #tpu.memory_space<any>>
    %6 = tpu.memref_slice %arg2[%c1_i32] : memref<2x!tpu.dma_semaphore, #tpu.memory_space<semaphore_mem>> -> memref<1x!tpu.dma_semaphore, #tpu.memory_space<semaphore_mem>>
    %7 = tpu.memref_squeeze %6 : memref<1x!tpu.dma_semaphore, #tpu.memory_space<semaphore_mem>> -> memref<!tpu.dma_semaphore, #tpu.memory_space<semaphore_mem>>
    tpu.enqueue_dma source(%4 : memref<8x128xf32, #tpu.memory_space<any>>) target(%5 : memref<8x128xf32, #tpu.memory_space<any>>) target_semaphore(%7 : memref<!tpu.dma_semaphore, #tpu.memory_space<semaphore_mem>>)
    %c0_i32_7 = arith.constant 0 : i32
    %c0_i32_8 = arith.constant 0 : i32
    %c0_i32_9 = arith.constant 0 : i32
    %8 = tpu.memref_slice %arg0[%c0_i32_8, %c0_i32_9] : memref<16x128xf32, #tpu.memory_space<any>> -> memref<8x128xf32, #tpu.memory_space<any>>
    %c0_i32_10 = arith.constant 0 : i32
    %c0_i32_11 = arith.constant 0 : i32
    %9 = tpu.memref_slice %arg1[%c0_i32_10, %c0_i32_11] : memref<16x128xf32, #tpu.memory_space<any>> -> memref<8x128xf32, #tpu.memory_space<any>>
    %10 = tpu.memref_slice %arg2[%c0_i32_7] : memref<2x!tpu.dma_semaphore, #tpu.memory_space<semaphore_mem>> -> memref<1x!tpu.dma_semaphore, #tpu.memory_space<semaphore_mem>>
    %11 = tpu.memref_squeeze %10 : memref<1x!tpu.dma_semaphore, #tpu.memory_space<semaphore_mem>> -> memref<!tpu.dma_semaphore, #tpu.memory_space<semaphore_mem>>
    tpu.wait_dma2 semaphore(%11 : memref<!tpu.dma_semaphore, #tpu.memory_space<semaphore_mem>>) src(%8 : memref<8x128xf32, #tpu.memory_space<any>>) dst(%9 : memref<8x128xf32, #tpu.memory_space<any>>)
    %c1_i32_12 = arith.constant 1 : i32
    %c8_i32_13 = arith.constant 8 : i32
    %c0_i32_14 = arith.constant 0 : i32
    %12 = tpu.memref_slice %arg0[%c8_i32_13, %c0_i32_14] : memref<16x128xf32, #tpu.memory_space<any>> -> memref<8x128xf32, #tpu.memory_space<any>>
    %c8_i32_15 = arith.constant 8 : i32
    %c0_i32_16 = arith.constant 0 : i32
    %13 = tpu.memref_slice %arg1[%c8_i32_15, %c0_i32_16] : memref<16x128xf32, #tpu.memory_space<any>> -> memref<8x128xf32, #tpu.memory_space<any>>
    %14 = tpu.memref_slice %arg2[%c1_i32_12] : memref<2x!tpu.dma_semaphore, #tpu.memory_space<semaphore_mem>> -> memref<1x!tpu.dma_semaphore, #tpu.memory_space<semaphore_mem>>
    %15 = tpu.memref_squeeze %14 : memref<1x!tpu.dma_semaphore, #tpu.memory_space<semaphore_mem>> -> memref<!tpu.dma_semaphore, #tpu.memory_space<semaphore_mem>>
    tpu.wait_dma2 semaphore(%15 : memref<!tpu.dma_semaphore, #tpu.memory_space<semaphore_mem>>) src(%12 : memref<8x128xf32, #tpu.memory_space<any>>) dst(%13 : memref<8x128xf32, #tpu.memory_space<any>>)
    return
  }
}

module attributes {stable_mosaic.version = 11 : i64} {
  func.func @_vmem_copy_kernel(%arg0: i32, %arg1: memref<8x256xf32, #tpu.memory_space<vmem>>, %arg2: memref<8x256xf32, #tpu.memory_space<vmem>>) attributes {dimension_semantics = [#tpu.dimension_semantics<parallel>], iteration_bounds = array<i64: 1>, scalar_prefetch = 0 : i64, scratch_operands = 0 : i64, tpu.core_type = #tpu.core_type<tc>, window_params = [{transform_indices = @transform_0, window_bounds = array<i64: 8, 256>}, {transform_indices = @transform_1, window_bounds = array<i64: 8, 256>}]} {
    %c0 = arith.constant 0 : index
    %c0_0 = arith.constant 0 : index
    %0 = vector.load %arg1[%c0, %c0_0] : memref<8x256xf32, #tpu.memory_space<vmem>>, vector<8x256xf32>
    %c0_1 = arith.constant 0 : index
    %c0_2 = arith.constant 0 : index
    %1 = vector.load %arg2[%c0_1, %c0_2] : memref<8x256xf32, #tpu.memory_space<vmem>>, vector<8x256xf32>
    tpu.vector_store %arg2[%c0_1, %c0_2], %0 {strides = array<i32>} : memref<8x256xf32, #tpu.memory_space<vmem>>, vector<8x256xf32>,
    return
  }
  func.func @transform_0(%arg0: i32) -> (i32, i32) {
    %c0_i32 = arith.constant 0 : i32
    %c0_i32_0 = arith.constant 0 : i32
    return %arg0, %c0_i32 : i32, i32
  }
  func.func @transform_1(%arg0: i32) -> (i32, i32) {
    %c0_i32 = arith.constant 0 : i32
    %c0_i32_0 = arith.constant 0 : i32
    return %arg0, %c0_i32 : i32, i32
  }
}

</mosaic_0001>

<bundles_post_ra>
// kernel: tpu_custom_call.1
= control target key start
LH: loop header
LB: loop body
LE: loop exit
PB: predicated region body
PF: predicated region fallthrough
CT: control target
= control target key end

     0   :  { %s60_s15 = smov [#allocation2]   ;;  %s61_s16 = smov [#allocation3]   ;;  %s87_s0 = inlined_call_operand.hbm [shape: f32[16,128], index: 0, kind: input, shape index: {}]   ;;  %s88_s1 = inlined_call_operand.hbm [shape: f32[16,128], index: 1, kind: output, shape index: {}]  }
   0x1   :  { %s10_s8 = sshll.u32 %s87_s0, 4  ;;  %s12_s11 = sshll.u32 %s88_s1, 4  ;;  %s11_s8 = int_to_ptr.hbm [resolvable:$true] %s10_s8  ;;  %s13_s11 = int_to_ptr.hbm [resolvable:$true] %s12_s11 }
   0x2   :  { %s17_s14 = scalar_lea.hbm %s87_s0, 8  ;;  %s62_s17 = smov 0  }
   0x3   :  { %16 = dma.general %s11_s8, 128, %s13_s11, %s60_s15, %s61_s16, [#allocation4], %s62_s17, 0  }
   0x4   :  { %s18_s20 = scalar_lea.hbm %s88_s1, 8  ;;  %s24_s21 = sshll.u32 %s17_s14, 4  ;;  %s25_s21 = int_to_ptr.hbm [resolvable:$true] %s24_s21 }
   0x5   :  { %s26_s22 = sshll.u32 %s18_s20, 4  ;;  %s63_s23 = smov [#allocation2 + $0x1]   ;;  %s27_s22 = int_to_ptr.hbm [resolvable:$true] %s26_s22 }
   0x6   :  { %s64_s24 = smov [#allocation5]  }
   0x7   :  { %30 = dma.general %s25_s21, 128, %s27_s22, %s63_s23, %s64_s24, [#allocation6], %s62_s17, 0  }
   0x8   :  { %56 = dma.done.wait [#allocation2], 128 }
   0x9   :  { %57 = vsyncadd [#allocation2], 4294967168 }
   0xa   :  { %58 = dma.done.wait [#allocation2 + $0x1], 128 }
   0xb   :  { %59 = vsyncadd [#allocation2 + $0x1], 4294967168 }
   0xc   :  { %36 = vsyncmov [#allocation2] }
   0xf   :  { %s37_s0 = vpop.sfrf %36 }
  0x10   :  { %p49_p0 = scmp.ne.s32.totalorder %s37_s0, 0 }
  0x12   :  { %41 = shalt.err (%p49_p0)  }
  0x13   :  { %43 = vsyncmov [#allocation2 + $0x1] }
  0x16   :  { %s44_s25 = vpop.sfrf %43 }
  0x17   :  { %p50_p1 = scmp.ne.s32.totalorder %s44_s25, 0 }
  0x19   :  { %48 = shalt.err (%p50_p1)  }

// kernel: tpu_custom_call.1
= control target key start
LH: loop header
LB: loop body
LE: loop exit
PB: predicated region body
PF: predicated region fallthrough
CT: control target
= control target key end

     0   :  { %6 = vsyncpa [#allocation3], 0  ;;  %s116_s0 = inlined_call_operand.hbm [shape: f32[8,256], index: 0, kind: input, shape index: {}]   ;;  %s117_s1 = inlined_call_operand.hbm [shape: f32[8,256], index: 1, kind: output, shape index: {}]  }
   0x1   :  { %7 = vsyncpa [#allocation4], 0  ;;  %s13_s8 = sshll.u32 %s116_s0, 4  ;;  %s98_s9 = smov [#allocation2]   ;;  %s14_s8 = int_to_ptr.hbm [resolvable:$true] %s13_s8 }
   0x2   :  { %s15_s10 = sshll.u32 %s98_s9, 4  ;;  %s16_s10 = int_to_ptr.vmem [resolvable:$true] %s15_s10 }
   0x3   :  { %18 = dma.hbm_to_vmem [thread:$0]  %s14_s8, 256, %s16_s10, [#allocation3]  }
   0x4   :  { %94 = dma.done.wait [#allocation3], 256  }
   0x5   :  { %95 = vsyncadd [#allocation3], 4294967040  ;;  %s99_s11 = smov [#allocation5]   ;;  %s34_s15 = sshll.u32 %s117_s1, 4  ;;  %v23_v0 = vld [vmem:[#allocation2] sm:$0xff]  ;;  %v24_v1 = vld [vmem:[#allocation2 + $0x8] sm:$0xff]  ;;  %s35_s15 = int_to_ptr.hbm [resolvable:$true] %s34_s15 }
   0x6   :  { %s32_s12 = sshll.u32 %s99_s11, 4  ;;  %25 = vst [vmem:[#allocation5] sm:$0xff] %v23_v0  ;;  %s33_s12 = int_to_ptr.vmem [resolvable:$true] %s32_s12 }
   0x7   :  { %26 = vst [vmem:[#allocation5 + $0x8] sm:$0xff] %v24_v1 }
   0x8   :  { %37 = dma.vmem_to_hbm [thread:$0]  %s33_s12, 256, %s35_s15, [#allocation4]  }
   0x9   :  { %96 = dma.done.wait [#allocation4], 256  }
   0xa   :  { %97 = vsyncadd [#allocation4], 4294967040 }
   0xb   :  { %42 = vsyncpa [#allocation3], 1 }
   0xc   :  { %43 = vsyncpa [#allocation4], 1 }

</bundles_post_ra>
